<compile_context>
chip_gen: v7x
topology: tpu7x:2x2x1
jax: 0.10.0
libtpu: 0.0.40
codegen_flags: <defaults>
</compile_context>

<pallas_src>
import functools

import jax
import jax.numpy as jnp
from jax import lax
from jax.experimental import pallas as pl
from jax.experimental.pallas import tpu as pltpu


def _convirt_kernel(v_ref, u_ref, out_ref,
                    rowsum_ref, colsum_ref, acc_logrow_ref, acc_diag_ref,
                    *, inv_temperature, weight, batch, nblocks):
    eps = 1e-8  # F.cosine_similarity eps (per-vector norm clamp)
    i = pl.program_id(0)  # row block (image rows)
    j = pl.program_id(1)  # col block (text rows)
    nb = nblocks

    @pl.when((i == 0) & (j == 0))
    def _init():
        colsum_ref[...] = jnp.zeros_like(colsum_ref)
        acc_logrow_ref[...] = jnp.zeros_like(acc_logrow_ref)
        acc_diag_ref[...] = jnp.zeros_like(acc_diag_ref)
        out_ref[...] = jnp.zeros_like(out_ref)

    @pl.when(j == 0)
    def _reset_row_acc():
        rowsum_ref[...] = jnp.zeros_like(rowsum_ref)

    v = v_ref[...]                     # (tb, D) image rows (native dtype -> MXU)
    u = u_ref[...]                     # (tb, D) text rows
    # Raw gram on the MXU, contracting the last (lane) dim of both operands.
    g = lax.dot_general(v, u, (((1,), (1,)), ((), ())),
                        preferred_element_type=jnp.float32)   # (tb, tb)

    # Reciprocal norms (f32), clamped like torch.cosine_similarity.
    v32 = v.astype(jnp.float32)
    u32 = u.astype(jnp.float32)
    rn_v = lax.rsqrt(jnp.maximum(jnp.sum(v32 * v32, axis=-1, keepdims=True),
                                 eps * eps))                   # (tb, 1)
    rn_u = lax.rsqrt(jnp.maximum(jnp.sum(u32 * u32, axis=-1, keepdims=True),
                                 eps * eps))                   # (tb, 1)

    # Rank-1 normalization + temperature, then shift by the bound 1/T (cos<=1):
    # z = (cos - 1)/T ; the shift cancels exactly in the final loss.
    cos = g * rn_v * rn_u.T                                    # (tb, tb)
    z = (cos - 1.0) * inv_temperature
    e = jnp.exp(z)

    # Row denominators (sum over text index j) -- accumulate across col blocks.
    rowsum_ref[...] += jnp.sum(e, axis=1, keepdims=True)       # (tb, 1)

    # Column denominators (sum over image index i) -- accumulate across row
    # blocks; ones-row matmul keeps this reduction on the MXU.
    ones_row = jnp.ones((1, e.shape[0]), jnp.float32)
    colsum_ref[j] += jnp.dot(ones_row, e,
                             preferred_element_type=jnp.float32)  # (1, tb)

    # Diagonal (numerator) terms live only in the i == j tiles; use z directly.
    @pl.when(i == j)
    def _diag():
        r_ids = lax.broadcasted_iota(jnp.int32, z.shape, 0)
        c_ids = lax.broadcasted_iota(jnp.int32, z.shape, 1)
        acc_diag_ref[...] += jnp.sum(jnp.where(r_ids == c_ids, z, 0.0),
                                     keepdims=True)

    # Row block finished: fold its log-denominators into the scalar accumulator.
    @pl.when(j == nb - 1)
    def _row_final():
        acc_logrow_ref[...] += jnp.sum(jnp.log(rowsum_ref[...]), keepdims=True)

    # Last grid step: column sums are complete -> finalize the weighted mean.
    @pl.when((i == nb - 1) & (j == nb - 1))
    def _finalize():
        sum_log_col = jnp.sum(jnp.log(colsum_ref[...]))
        total = (weight * acc_logrow_ref[...]
                 + (1.0 - weight) * sum_log_col
                 - acc_diag_ref[...])
        out_ref[...] = total * (1.0 / batch)


def convirt_loss(image_batch, text_batch, temperature: float = 1.0,
                 weight: float = 0.99, block_rows: int | None = None):
    """ConVIRTLoss forward; image_batch/text_batch: (B, D) arrays (f32 or bf16)."""
    assert image_batch.ndim == 2 and image_batch.shape == text_batch.shape
    B, D = image_batch.shape
    if block_rows is None:
        # Largest tile (<=256 rows) dividing B; fall back to a single full tile.
        block_rows = next((t for t in (256, 128, 64, 32, 16, 8) if B % t == 0), B)
    tb = int(block_rows)
    assert B % tb == 0, "block_rows must divide the batch size"
    nb = B // tb

    kernel = functools.partial(
        _convirt_kernel,
        inv_temperature=1.0 / float(temperature),
        weight=float(weight),
        batch=B,
        nblocks=nb,
    )

    out = pl.pallas_call(
        kernel,
        out_shape=jax.ShapeDtypeStruct((1, 1), jnp.float32),
        grid_spec=pltpu.PrefetchScalarGridSpec(
            num_scalar_prefetch=0,
            grid=(nb, nb),
            in_specs=[
                pl.BlockSpec((tb, D), lambda i, j: (i, 0)),   # image rows
                pl.BlockSpec((tb, D), lambda i, j: (j, 0)),   # text rows
            ],
            out_specs=pl.BlockSpec((1, 1), lambda i, j: (0, 0)),
            scratch_shapes=[
                pltpu.VMEM((tb, 1), jnp.float32),      # row-denominator accumulator
                pltpu.VMEM((nb, 1, tb), jnp.float32),  # column-denominator accumulator
                pltpu.VMEM((1, 1), jnp.float32),       # sum_i log(rowdenom_i)
                pltpu.VMEM((1, 1), jnp.float32),       # sum_i diag(z)_i
            ],
        ),
        compiler_params=pltpu.CompilerParams(
            # Both axes carry cross-block accumulators -> sequential grid.
            dimension_semantics=("arbitrary", "arbitrary"),
            vmem_limit_bytes=32 * 1024 * 1024,
        ),
    )(image_batch, text_batch)
    return out[0, 0]


def _reference_loss(v, u, temperature=1.0, weight=0.99):
    """Pure-JAX reference mirroring the PyTorch ConVIRTLoss module."""
    eps = 1e-8
    vn = v / jnp.maximum(jnp.linalg.norm(v, axis=-1, keepdims=True), eps)
    un = u / jnp.maximum(jnp.linalg.norm(u, axis=-1, keepdims=True), eps)
    s = (vn @ un.T) / temperature
    exp_s = jnp.exp(s)
    diag = jnp.diagonal(exp_s)
    i2t = -jnp.log(diag / jnp.sum(exp_s, axis=1))
    t2i = -jnp.log(diag / jnp.sum(exp_s, axis=0))
    return jnp.mean(weight * i2t + (1.0 - weight) * t2i)


if __name__ == "__main__":
    key = jax.random.PRNGKey(0)
    k1, k2 = jax.random.split(key)
    B, D = 16, 32
    image_batch = jax.random.normal(k1, (B, D), dtype=jnp.float32)
    text_batch = jax.random.normal(k2, (B, D), dtype=jnp.float32)

    # Multi-tile path: 2x2 grid of (8, D) blocks exercises row/col/diag accumulation.
    loss_tiled = jax.block_until_ready(
        convirt_loss(image_batch, text_batch, temperature=1.0, weight=0.99,
                     block_rows=8))
    # Single-tile path (whole batch in one block).
    loss_single = jax.block_until_ready(
        convirt_loss(image_batch, text_batch, temperature=1.0, weight=0.99))

    ref = _reference_loss(image_batch, text_batch, temperature=1.0, weight=0.99)
    assert jnp.allclose(loss_tiled, ref, rtol=1e-4, atol=1e-5), (loss_tiled, ref)
    assert jnp.allclose(loss_single, ref, rtol=1e-4, atol=1e-5), (loss_single, ref)

    print("KERNEL_OK")
</pallas_src>

<mosaic_0001>
module attributes {stable_mosaic.version = 11 : i64} {
  func.func @_convirt_kernel(%arg0: i32, %arg1: i32, %arg2: memref<8x32xf32, #tpu.memory_space<vmem>>, %arg3: memref<8x32xf32, #tpu.memory_space<vmem>>, %arg4: memref<1x1xf32, #tpu.memory_space<vmem>>, %arg5: memref<8x1xf32, #tpu.memory_space<vmem>>, %arg6: memref<2x1x8xf32, #tpu.memory_space<vmem>>, %arg7: memref<1x1xf32, #tpu.memory_space<vmem>>, %arg8: memref<1x1xf32, #tpu.memory_space<vmem>>) attributes {dimension_semantics = [#tpu.dimension_semantics<arbitrary>, #tpu.dimension_semantics<arbitrary>], iteration_bounds = array<i64: 2, 2>, scalar_prefetch = 0 : i64, scratch_operands = 4 : i64, tpu.core_type = #tpu.core_type<tc>, window_params = [{transform_indices = @transform_0, window_bounds = array<i64: 8, 32>}, {transform_indices = @transform_1, window_bounds = array<i64: 8, 32>}, {pipeline_mode = #tpu.pipeline_mode<synchronous>, transform_indices = @transform_2, window_bounds = array<i64: 1, 1>}]} {
    %c0_i32 = arith.constant 0 : i32
    %0 = arith.cmpi eq, %arg0, %c0_i32 : i32
    %c0_i32_0 = arith.constant 0 : i32
    %1 = arith.cmpi eq, %arg1, %c0_i32_0 : i32
    %2 = arith.andi %0, %1 : i1
    %3 = arith.extui %2 : i1 to i32
    %c0_i32_1 = arith.constant 0 : i32
    %4 = arith.cmpi ne, %3, %c0_i32_1 : i32
    scf.if %4 {
      %cst_29 = arith.constant 0.000000e+00 : f32
      %59 = vector.broadcast %cst_29 : f32 to vector<2x1x8xf32>
      %c0_30 = arith.constant 0 : index
      %c0_31 = arith.constant 0 : index
      %c0_32 = arith.constant 0 : index
      %60 = vector.load %arg6[%c0_30, %c0_31, %c0_32] : memref<2x1x8xf32, #tpu.memory_space<vmem>>, vector<2x1x8xf32>
      tpu.vector_store %arg6[%c0_30, %c0_31, %c0_32], %59 {strides = array<i32>} : memref<2x1x8xf32, #tpu.memory_space<vmem>>, vector<2x1x8xf32>,
      %cst_33 = arith.constant 0.000000e+00 : f32
      %61 = vector.broadcast %cst_33 : f32 to vector<1x1xf32>
      %c0_34 = arith.constant 0 : index
      %c0_35 = arith.constant 0 : index
      %62 = vector.load %arg7[%c0_34, %c0_35] : memref<1x1xf32, #tpu.memory_space<vmem>>, vector<1x1xf32>
      tpu.vector_store %arg7[%c0_34, %c0_35], %61 {strides = array<i32>} : memref<1x1xf32, #tpu.memory_space<vmem>>, vector<1x1xf32>,
      %cst_36 = arith.constant 0.000000e+00 : f32
      %63 = vector.broadcast %cst_36 : f32 to vector<1x1xf32>
      %c0_37 = arith.constant 0 : index
      %c0_38 = arith.constant 0 : index
      %64 = vector.load %arg8[%c0_37, %c0_38] : memref<1x1xf32, #tpu.memory_space<vmem>>, vector<1x1xf32>
      tpu.vector_store %arg8[%c0_37, %c0_38], %63 {strides = array<i32>} : memref<1x1xf32, #tpu.memory_space<vmem>>, vector<1x1xf32>,
      %cst_39 = arith.constant 0.000000e+00 : f32
      %65 = vector.broadcast %cst_39 : f32 to vector<1x1xf32>
      %c0_40 = arith.constant 0 : index
      %c0_41 = arith.constant 0 : index
      %66 = vector.load %arg4[%c0_40, %c0_41] : memref<1x1xf32, #tpu.memory_space<vmem>>, vector<1x1xf32>
      tpu.vector_store %arg4[%c0_40, %c0_41], %65 {strides = array<i32>} : memref<1x1xf32, #tpu.memory_space<vmem>>, vector<1x1xf32>,
    } else {
    }
    %c0_i32_2 = arith.constant 0 : i32
    %5 = arith.cmpi eq, %arg1, %c0_i32_2 : i32
    %6 = arith.extui %5 : i1 to i32
    %c0_i32_3 = arith.constant 0 : i32
    %7 = arith.cmpi ne, %6, %c0_i32_3 : i32
    scf.if %7 {
      %cst_29 = arith.constant 0.000000e+00 : f32
      %59 = vector.broadcast %cst_29 : f32 to vector<8x1xf32>
      %c0_30 = arith.constant 0 : index
      %c0_31 = arith.constant 0 : index
      %60 = vector.load %arg5[%c0_30, %c0_31] : memref<8x1xf32, #tpu.memory_space<vmem>>, vector<8x1xf32>
      tpu.vector_store %arg5[%c0_30, %c0_31], %59 {strides = array<i32>} : memref<8x1xf32, #tpu.memory_space<vmem>>, vector<8x1xf32>,
    } else {
    }
    %c0 = arith.constant 0 : index
    %c0_4 = arith.constant 0 : index
    %8 = vector.load %arg2[%c0, %c0_4] : memref<8x32xf32, #tpu.memory_space<vmem>>, vector<8x32xf32>
    %c0_5 = arith.constant 0 : index
    %c0_6 = arith.constant 0 : index
    %9 = vector.load %arg3[%c0_5, %c0_6] : memref<8x32xf32, #tpu.memory_space<vmem>>, vector<8x32xf32>
    %cst = arith.constant dense<0.000000e+00> : vector<8x8xf32>
    %10 = tpu.matmul %8, %9, %cst {dimension_numbers = #tpu.dot_dimension_numbers<[1], [1], [0], [0], [0, 0, 1, 0], [], []>} : vector<8x32xf32>, vector<8x32xf32>, vector<8x8xf32> -> vector<8x8xf32>
    %11 = arith.mulf %8, %8 : vector<8x32xf32>
    %cst_7 = arith.constant dense<0.000000e+00> : vector<8xf32>
    %12 = vector.multi_reduction <add>, %11, %cst_7 [1] : vector<8x32xf32> to vector<8xf32>
    %13 = vector.shape_cast %12 : vector<8xf32> to vector<8x1xf32>
    %cst_8 = arith.constant 1.000000e-16 : f32
    %14 = vector.broadcast %cst_8 : f32 to vector<8x1xf32>
    %15 = arith.maximumf %13, %14 : vector<8x1xf32>
    %16 = math.rsqrt %15 : vector<8x1xf32>
    %17 = arith.mulf %9, %9 : vector<8x32xf32>
    %cst_9 = arith.constant dense<0.000000e+00> : vector<8xf32>
    %18 = vector.multi_reduction <add>, %17, %cst_9 [1] : vector<8x32xf32> to vector<8xf32>
    %19 = vector.shape_cast %18 : vector<8xf32> to vector<8x1xf32>
    %cst_10 = arith.constant 1.000000e-16 : f32
    %20 = vector.broadcast %cst_10 : f32 to vector<8x1xf32>
    %21 = arith.maximumf %19, %20 : vector<8x1xf32>
    %22 = math.rsqrt %21 : vector<8x1xf32>
    %23 = vector.broadcast %16 : vector<8x1xf32> to vector<8x8xf32>
    %24 = arith.mulf %10, %23 : vector<8x8xf32>
    %25 = tpu.transpose %22, [1, 0] : vector<8x1xf32> -> vector<1x8xf32>
    %26 = vector.broadcast %25 : vector<1x8xf32> to vector<8x8xf32>
    %27 = arith.mulf %24, %26 : vector<8x8xf32>
    %cst_11 = arith.constant 1.000000e+00 : f32
    %28 = vector.broadcast %cst_11 : f32 to vector<8x8xf32>
    %29 = arith.subf %27, %28 : vector<8x8xf32>
    %cst_12 = arith.constant 1.000000e+00 : f32
    %30 = vector.broadcast %cst_12 : f32 to vector<8x8xf32>
    %31 = arith.mulf %29, %30 : vector<8x8xf32>
    %32 = math.exp %31 : vector<8x8xf32>
    %c0_13 = arith.constant 0 : index
    %c0_14 = arith.constant 0 : index
    %33 = vector.load %arg5[%c0_13, %c0_14] : memref<8x1xf32, #tpu.memory_space<vmem>>, vector<8x1xf32>
    %cst_15 = arith.constant dense<0.000000e+00> : vector<8xf32>
    %34 = vector.multi_reduction <add>, %32, %cst_15 [1] : vector<8x8xf32> to vector<8xf32>
    %35 = vector.shape_cast %34 : vector<8xf32> to vector<8x1xf32>
    %36 = arith.addf %33, %35 : vector<8x1xf32>
    %c0_16 = arith.constant 0 : index
    %c0_17 = arith.constant 0 : index
    %37 = vector.load %arg5[%c0_16, %c0_17] : memref<8x1xf32, #tpu.memory_space<vmem>>, vector<8x1xf32>
    tpu.vector_store %arg5[%c0_16, %c0_17], %36 {strides = array<i32>} : memref<8x1xf32, #tpu.memory_space<vmem>>, vector<8x1xf32>,
    %cst_18 = arith.constant 1.000000e+00 : f32
    %38 = vector.broadcast %cst_18 : f32 to vector<1x8xf32>
    %39 = arith.index_cast %arg1 : i32 to index
    %c0_19 = arith.constant 0 : index
    %c0_20 = arith.constant 0 : index
    %40 = vector.load %arg6[%39, %c0_19, %c0_20] : memref<2x1x8xf32, #tpu.memory_space<vmem>>, vector<1x1x8xf32>
    %41 = vector.shape_cast %40 : vector<1x1x8xf32> to vector<1x8xf32>
    %cst_21 = arith.constant dense<0.000000e+00> : vector<1x8xf32>
    %42 = tpu.matmul %38, %32, %cst_21 {dimension_numbers = #tpu.dot_dimension_numbers<[1], [0], [0], [1], [0, 0, 1, 1], [], []>} : vector<1x8xf32>, vector<8x8xf32>, vector<1x8xf32> -> vector<1x8xf32>
    %43 = arith.addf %41, %42 : vector<1x8xf32>
    %44 = arith.index_cast %arg1 : i32 to index
    %c0_22 = arith.constant 0 : index
    %c0_23 = arith.constant 0 : index
    %45 = vector.load %arg6[%44, %c0_22, %c0_23] : memref<2x1x8xf32, #tpu.memory_space<vmem>>, vector<1x1x8xf32>
    %46 = vector.shape_cast %45 : vector<1x1x8xf32> to vector<1x8xf32>
    %47 = vector.shape_cast %43 : vector<1x8xf32> to vector<1x1x8xf32>
    tpu.vector_store %arg6[%44, %c0_22, %c0_23], %47 {strides = array<i32>} : memref<2x1x8xf32, #tpu.memory_space<vmem>>, vector<1x1x8xf32>,
    %48 = arith.cmpi eq, %arg0, %arg1 : i32
    %49 = arith.extui %48 : i1 to i32
    %c0_i32_24 = arith.constant 0 : i32
    %50 = arith.cmpi ne, %49, %c0_i32_24 : i32
    scf.if %50 {
      %59 = tpu.iota {dimensions = array<i32: 0>} : vector<8x8xi32>
      %60 = tpu.iota {dimensions = array<i32: 1>} : vector<8x8xi32>
      %c0_29 = arith.constant 0 : index
      %c0_30 = arith.constant 0 : index
      %61 = vector.load %arg8[%c0_29, %c0_30] : memref<1x1xf32, #tpu.memory_space<vmem>>, vector<1x1xf32>
      %62 = arith.cmpi eq, %59, %60 : vector<8x8xi32>
      %cst_31 = arith.constant 0.000000e+00 : f32
      %63 = vector.broadcast %cst_31 : f32 to vector<8x8xf32>
      %64 = arith.select %62, %31, %63 : vector<8x8xi1>, vector<8x8xf32>
      %65 = vector.shape_cast %64 : vector<8x8xf32> to vector<1x8x8xf32>
      %cst_32 = arith.constant dense<0.000000e+00> : vector<1xf32>
      %66 = vector.multi_reduction <add>, %65, %cst_32 [1, 2] : vector<1x8x8xf32> to vector<1xf32>
      %67 = vector.shape_cast %66 : vector<1xf32> to vector<1x1x1xf32>
      %68 = vector.extract %67[0, 0, 0] : f32 from vector<1x1x1xf32>
      %69 = vector.broadcast %68 : f32 to vector<1x1xf32>
      %70 = arith.addf %61, %69 : vector<1x1xf32>
      %c0_33 = arith.constant 0 : index
      %c0_34 = arith.constant 0 : index
      %71 = vector.load %arg8[%c0_33, %c0_34] : memref<1x1xf32, #tpu.memory_space<vmem>>, vector<1x1xf32>
      tpu.vector_store %arg8[%c0_33, %c0_34], %70 {strides = array<i32>} : memref<1x1xf32, #tpu.memory_space<vmem>>, vector<1x1xf32>,
    } else {
    }
    %c1_i32 = arith.constant 1 : i32
    %51 = arith.cmpi eq, %arg1, %c1_i32 : i32
    %52 = arith.extui %51 : i1 to i32
    %c0_i32_25 = arith.constant 0 : i32
    %53 = arith.cmpi ne, %52, %c0_i32_25 : i32
    scf.if %53 {
      %c0_29 = arith.constant 0 : index
      %c0_30 = arith.constant 0 : index
      %59 = vector.load %arg7[%c0_29, %c0_30] : memref<1x1xf32, #tpu.memory_space<vmem>>, vector<1x1xf32>
      %c0_31 = arith.constant 0 : index
      %c0_32 = arith.constant 0 : index
      %60 = vector.load %arg5[%c0_31, %c0_32] : memref<8x1xf32, #tpu.memory_space<vmem>>, vector<8x1xf32>
      %61 = math.log %60 : vector<8x1xf32>
      %62 = vector.shape_cast %61 : vector<8x1xf32> to vector<1x8x1xf32>
      %cst_33 = arith.constant dense<0.000000e+00> : vector<1xf32>
      %63 = vector.multi_reduction <add>, %62, %cst_33 [1, 2] : vector<1x8x1xf32> to vector<1xf32>
      %64 = vector.shape_cast %63 : vector<1xf32> to vector<1x1x1xf32>
      %65 = vector.extract %64[0, 0, 0] : f32 from vector<1x1x1xf32>
      %66 = vector.broadcast %65 : f32 to vector<1x1xf32>
      %67 = arith.addf %59, %66 : vector<1x1xf32>
      %c0_34 = arith.constant 0 : index
      %c0_35 = arith.constant 0 : index
      %68 = vector.load %arg7[%c0_34, %c0_35] : memref<1x1xf32, #tpu.memory_space<vmem>>, vector<1x1xf32>
      tpu.vector_store %arg7[%c0_34, %c0_35], %67 {strides = array<i32>} : memref<1x1xf32, #tpu.memory_space<vmem>>, vector<1x1xf32>,
    } else {
    }
    %c1_i32_26 = arith.constant 1 : i32
    %54 = arith.cmpi eq, %arg0, %c1_i32_26 : i32
    %c1_i32_27 = arith.constant 1 : i32
    %55 = arith.cmpi eq, %arg1, %c1_i32_27 : i32
    %56 = arith.andi %54, %55 : i1
    %57 = arith.extui %56 : i1 to i32
    %c0_i32_28 = arith.constant 0 : i32
    %58 = arith.cmpi ne, %57, %c0_i32_28 : i32
    scf.if %58 {
      %c0_29 = arith.constant 0 : index
      %c0_30 = arith.constant 0 : index
      %c0_31 = arith.constant 0 : index
      %59 = vector.load %arg6[%c0_29, %c0_30, %c0_31] : memref<2x1x8xf32, #tpu.memory_space<vmem>>, vector<2x1x8xf32>
      %60 = math.log %59 : vector<2x1x8xf32>
      %61 = vector.shape_cast %60 : vector<2x1x8xf32> to vector<1x2x1x8xf32>
      %cst_32 = arith.constant dense<0.000000e+00> : vector<1xf32>
      %62 = vector.multi_reduction <add>, %61, %cst_32 [1, 2, 3] : vector<1x2x1x8xf32> to vector<1xf32>
      %63 = vector.shape_cast %62 : vector<1xf32> to vector<1x1x1x1xf32>
      %64 = vector.extract %63[0, 0, 0, 0] : f32 from vector<1x1x1x1xf32>
      %c0_33 = arith.constant 0 : index
      %c0_34 = arith.constant 0 : index
      %65 = vector.load %arg7[%c0_33, %c0_34] : memref<1x1xf32, #tpu.memory_space<vmem>>, vector<1x1xf32>
      %cst_35 = arith.constant 9.900000e-01 : f32
      %66 = vector.broadcast %cst_35 : f32 to vector<1x1xf32>
      %67 = arith.mulf %66, %65 : vector<1x1xf32>
      %cst_36 = arith.constant 0.00999999977 : f32
      %68 = arith.mulf %cst_36, %64 : f32
      %69 = vector.broadcast %68 : f32 to vector<1x1xf32>
      %70 = arith.addf %67, %69 : vector<1x1xf32>
      %c0_37 = arith.constant 0 : index
      %c0_38 = arith.constant 0 : index
      %71 = vector.load %arg8[%c0_37, %c0_38] : memref<1x1xf32, #tpu.memory_space<vmem>>, vector<1x1xf32>
      %72 = arith.subf %70, %71 : vector<1x1xf32>
      %cst_39 = arith.constant 6.250000e-02 : f32
      %73 = vector.broadcast %cst_39 : f32 to vector<1x1xf32>
      %74 = arith.mulf %72, %73 : vector<1x1xf32>
      %c0_40 = arith.constant 0 : index
      %c0_41 = arith.constant 0 : index
      %75 = vector.load %arg4[%c0_40, %c0_41] : memref<1x1xf32, #tpu.memory_space<vmem>>, vector<1x1xf32>
      tpu.vector_store %arg4[%c0_40, %c0_41], %74 {strides = array<i32>} : memref<1x1xf32, #tpu.memory_space<vmem>>, vector<1x1xf32>,
    } else {
    }
    return
  }
  func.func @transform_0(%arg0: i32, %arg1: i32) -> (i32, i32) {
    %c0_i32 = arith.constant 0 : i32
    %c0_i32_0 = arith.constant 0 : i32
    return %arg0, %c0_i32 : i32, i32
  }
  func.func @transform_1(%arg0: i32, %arg1: i32) -> (i32, i32) {
    %c0_i32 = arith.constant 0 : i32
    %c0_i32_0 = arith.constant 0 : i32
    return %arg1, %c0_i32 : i32, i32
  }
  func.func @transform_2(%arg0: i32, %arg1: i32) -> (i32, i32) {
    %c0_i32 = arith.constant 0 : i32
    %c0_i32_0 = arith.constant 0 : i32
    %c0_i32_1 = arith.constant 0 : i32
    return %c0_i32, %c0_i32_0 : i32, i32
  }
}

</mosaic_0001>

<bundles_post_ra>
// kernel: tpu_custom_call.1
= control target key start
LH: loop header
LB: loop body
LE: loop exit
PB: predicated region body
PF: predicated region fallthrough
CT: control target
= control target key end

     0   :  { %7 = vsyncpa [#allocation7], 0  ;;  %s1276_s0 = inlined_call_operand.hbm [shape: f32[16,32], index: 0, kind: input, shape index: {}]   ;;  %s1277_s1 = inlined_call_operand.hbm [shape: f32[16,32], index: 1, kind: input, shape index: {}]   ;;  %s1278_s2 = inlined_call_operand.hbm [shape: f32[1,1], index: 2, kind: output, shape index: {}]  }
   0x1   :  { %9 = vsyncpa [#allocation7 + $0x1], 0 }
   0x2   :  { %10 = vsyncpa [#allocation10], 0 }
   0x3   :  { %12 = vsyncpa [#allocation10 + $0x1], 0 }
   0x4   :  { %13 = vsyncpa [#allocation8], 0  ;;  %s979_s9 = smov 0   ;;  %s981_s10 = smov 0  }
   0x5   :  { %s983_s11 = smov 0   ;;  %s985_s12 = smov 0  }
   0x6   :  { %s987_s13 = smov 0   ;;  %s989_s14 = smov 0  }
   0x7   :  { %s991_s15 = smov 0   ;;  %s993_s16 = smov 0  }
   0x8   :  { %s995_s17 = smov 0   ;;  %s997_s18 = smov 0  }
   0x9   :  { %s999_s19 = smov 0  }
   0xa LB: > { %s1282_s20 = sadd.s32 4294967295, %s954_s19   ;;  %s31_s21 = sadd.s32 1, %s950_s18  ;;  %s954_s19 = sphi %s999_s19, %s19_s19   ;;  %s950_s18 = sphi %s997_s18, %s1308_s18   ;;  %s946_s17 = sphi %s995_s17, %s1307_s17   ;;  %s942_s16 = sphi %s993_s16, %s1306_s16   ;;  %s938_s15 = sphi %s991_s15, %s1305_s15   ;;  %s934_s14 = sphi %s989_s14, %s1304_s14   ;;  %s930_s13 = sphi %s987_s13, %s1303_s13   ;;  %s926_s12 = sphi %s985_s12, %s1302_s12   ;;  %s922_s11 = sphi %s983_s11, %s1301_s11   ;;  %s918_s10 = sphi %s981_s10, %s1300_s10   ;;  %s914_s9 = sphi %s979_s9, %s1299_s9  }
   0xb   : > { %p45_p0 = scmp.ne.s32.totalorder %s934_s14, %s930_s13  ;;  %p1280_p1 = scmp.eq.s32.totalorder %s954_s19, 0 }
   0xc   : > { %p51_p2 = scmp.ne.s32.totalorder %s930_s13, %s926_s12  ;;  %p1040_p3 = scmp.eq.s32.totalorder %s1282_s20, 0 }
   0xd   : > { %p47_p4 = por %p1280_p1, %p45_p0  ;;  %p1279_p5 = scmp.lt.s32.totalorder %s954_s19, 4 }
   0xe   : > { %p1049_p6 = por %p1040_p3, %p51_p2  ;;  %s122_s24 = sand.u32 1, %s934_s14  }
   0xf   : > { %s608_s25 = sshll.u32 %s122_s24, 3  ;;  %s609_s26 = sshll.u32 %s950_s18, 7 }
  0x10   : > { %s1285_s23 = scalar_select %p1049_p6, 1, 0 }
  0x11   : > { %s1058_s29 = scalar_lea.hbm %s1276_s0, %s609_s26  ;;  %s126_s30 = scalar_lea.vmem [#allocation6], %s608_s25 }
  0x12   : > { %s133_s3 = sshll.u32 %s126_s30, 4  ;;  %p1064_p7 = pnand %p1279_p5, %p47_p4  ;;  %s1060_s3 = int_to_ptr.vmem [resolvable:$true] %s133_s3 }
  0x13   : > { %s123_s5 = scalar_lea.sflag [#allocation7], %s122_s24  ;;  %s770_s6 = scalar_lea.hbm %s1058_s29, 128 }
  0x14   : > { %p771_p10 = scmp.ne.s32.totalorder %s1058_s29, %s770_s6  ;;  %p772_p11 = pneg %p1064_p7 }
  0x15   : > { %s775_s12 = scalar_lea.hbm %s1276_s0, 256  ;;  %p776_p0 = scmp.lt.u32.totalorder %s1058_s29, %s1276_s0 }
  0x16   : > { %p773_p12 = pnand %p772_p11, %p771_p10  ;;  %p777_p2 = scmp.lt.u32.totalorder %s775_s12, %s770_s6 }
  0x17   : > { %p779_p5 = scmp.lt.u32.totalorder %s770_s6, %s1058_s29 }
  0x18   : > { %p774_p13 = pneg %p773_p12  ;;  %p778_p4 = por %p777_p2, %p776_p0 }
  0x1a   : > { %p780_p1 = por %p779_p5, %p778_p4 }
  0x1c   : > { %p781_p8 = pnand %p780_p1, %p774_p13 }
  0x1e   : > { %784 = shalt.err (!%p781_p8)
}
  0x1f   : > { %s785_s24 = scalar_lea.vmem %s1060_s3, 128  ;;  %s956_s27 = smov [#allocation6]  }
  0x20   : > { %p786_p10 = scmp.ne.s32.totalorder %s1060_s3, %s785_s24  ;;  %s790_s28 = sshll.u32 %s956_s27, 4  ;;  %s791_s28 = int_to_ptr.vmem [resolvable:$false] %s790_s28 }
  0x21   : > { %s792_s30 = scalar_lea.vmem %s791_s28, 256  ;;  %p793_p6 = scmp.lt.s32.totalorder %s1060_s3, %s791_s28 }
  0x22   : > { %p788_p12 = pnand %p786_p10, %p772_p11  ;;  %p794_p0 = scmp.lt.s32.totalorder %s792_s30, %s785_s24 }
  0x24   : > { %p789_p9 = pneg %p788_p12  ;;  %p795_p2 = por %p794_p0, %p793_p6 }
  0x26   : > { %p796_p5 = pnand %p795_p2, %p789_p9 }
  0x28   : > { %799 = shalt.err (!%p796_p5)
}
  0x29   : > { %657 = dma.hbm_to_vmem [thread:$0]  (!%p1064_p7), %s1058_s29, 128, %s1060_s3, %s123_s5  }
  0x2a   : > { %p1287_p1 = scmp.lt.s32.totalorder %s954_s19, 5  ;;  %p1288_p6 = scmp.ge.s32.totalorder %s954_s19, 1 }
  0x2b   : > { %s38_s6 = sadd.s32 1, %s934_s14  ;;  %s28_s7 = sadd.s32 1, %s946_s17 }
  0x2c   : > { %p1099_p8 = pnand %p1288_p6, %p1287_p1  ;;  %p29_p9 = scmp.ge.s32.totalorder %s28_s7, 2 }
  0x2d   : > { %s64_s8 = sadd.s32 1, %s922_s11  ;;  %p71_p11 = scmp.ne.s32.totalorder %s922_s11, %s918_s10 }
  0x2e   : > { %p77_p13 = scmp.ne.s32.totalorder %s918_s10, %s914_s9  ;;  %s1310_s7 = smov (%p29_p9, %s28_s7), 0 }
  0x2f   : > { %s1312_s21 = smov (!%p29_p9, %s31_s21), %s950_s18  ;;  %s61_s29 = ssub.s32 %s946_s17, %s1310_s7 }
  0x30   : > { %s140_s3 = sand.u32 1, %s922_s11   ;;  %p33_p7 = scmp.ge.s32.totalorder %s1312_s21, 2 }
  0x31   : > { %p62_p4 = scmp.eq.s32.totalorder %s61_s29, 0  ;;  %p1290_p10 = scmp.eq.s32.totalorder %s954_s19, 0 }
  0x32   : > { %p1126_p0 = por %p77_p13, %p1040_p3  ;;  %s1314_s21 = smov (%p33_p7, %s1312_s21), 0 }
  0x33   : > { %p1120_p12 = por %p71_p11, %p1290_p10  ;;  %s35_s25 = ssub.s32 %s950_s18, %s1314_s21 }
  0x34   : > { %s1292_s9 = scalar_select %p1126_p0, 1, 0 }
  0x35   : > { %s1133_s12 = scalar_select %p62_p4, %s922_s11, %s64_s8  }
  0x36   : > { %s610_s26 = sshll.u32 %s140_s3, 3  ;;  %p36_p2 = scmp.eq.s32.totalorder %s35_s25, 0 }
  0x37   : > { %s611_s24 = sshll.u32 %s946_s17, 7  ;;  %s144_s27 = scalar_lea.vmem [#allocation9], %s610_s26 }
  0x38   : > { %s151_s28 = sshll.u32 %s144_s27, 4  ;;  %s1144_s20 = scalar_lea.hbm %s1277_s1, %s611_s24  ;;  %s1146_s28 = int_to_ptr.vmem [resolvable:$true] %s151_s28 }
  0x39   : > { %s1139_s30 = scalar_select %p36_p2, %s934_s14, %s38_s6  }
  0x3a   : > { %p1293_p3 = scmp.lt.s32.totalorder %s954_s19, 4  ;;  %s141_s6 = scalar_lea.sflag [#allocation10], %s140_s3 }
  0x3b   : > { %s800_s25 = scalar_lea.hbm %s1144_s20, 128  ;;  %s805_s5 = scalar_lea.hbm %s1277_s1, 256 }
  0x3c   : > { %p1152_p5 = pnand %p1293_p3, %p1120_p12  ;;  %p801_p1 = scmp.ne.s32.totalorder %s1144_s20, %s800_s25 }
  0x3d   : > { %p806_p13 = scmp.lt.u32.totalorder %s1144_s20, %s1277_s1  ;;  %p807_p7 = scmp.lt.u32.totalorder %s805_s5, %s800_s25 }
  0x3e   : > { %p802_p6 = pneg %p1152_p5  ;;  %p809_p10 = scmp.lt.u32.totalorder %s800_s25, %s1144_s20 }
  0x3f   : > { %p808_p4 = por %p807_p7, %p806_p13 }
  0x40   : > { %p803_p9 = pnand %p802_p6, %p801_p1 }
  0x41   : > { %p810_p12 = por %p809_p10, %p808_p4 }
  0x42   : > { %p804_p11 = pneg %p803_p9 }
  0x44   : > { %p811_p2 = pnand %p810_p12, %p804_p11 }
  0x46   : > { %814 = shalt.err (!%p811_p2)
}
  0x47   : > { %s815_s3 = scalar_lea.vmem %s1146_s28, 128  ;;  %s957_s22 = smov [#allocation9]  }
  0x48   : > { %p816_p3 = scmp.ne.s32.totalorder %s1146_s28, %s815_s3  ;;  %s820_s26 = sshll.u32 %s957_s22, 4  ;;  %s821_s26 = int_to_ptr.vmem [resolvable:$false] %s820_s26 }
  0x49   : > { %s822_s24 = scalar_lea.vmem %s821_s26, 256  ;;  %p823_p0 = scmp.lt.s32.totalorder %s1146_s28, %s821_s26 }
  0x4a   : > { %p818_p1 = pnand %p816_p3, %p802_p6  ;;  %p824_p13 = scmp.lt.s32.totalorder %s822_s24, %s815_s3 }
  0x4c   : > { %p819_p9 = pneg %p818_p1  ;;  %p825_p7 = por %p824_p13, %p823_p0 }
  0x4e   : > { %p826_p4 = pnand %p825_p7, %p819_p9 }
  0x50   : > { %829 = shalt.err (!%p826_p4)
}
  0x51   : > { %660 = dma.hbm_to_vmem [thread:$0]  (!%p1152_p5), %s1144_s20, 128, %s1146_s28, %s141_s6  }
  0x52   : > { %160 = sbr.rel (%p1099_p8) target bundleno = 1121 (0x461), region = 28  ;;  %s162_s25 = sand.u32 (!%p1099_p8), 1, %s930_s13  }
  0x53   : > { %s1184_s5 = sshll.u32 (!%p1099_p8), %s162_s25, 3  ;;  %s163_s27 = scalar_lea.sflag (!%p1099_p8), [#allocation7], %s162_s25 }
  0x54   : > { %s166_s29 = scalar_lea.vmem (!%p1099_p8), [#allocation6], %s1184_s5  ;;  %p1295_p6 = scmp.ne.s32.totalorder (!%p1099_p8), %s1285_s23, 0 }
  0x59   : > { %901 = dma.done.wait (%p1295_p6), %s163_s27, 128  }
  0x5a   : > { %903 = vsyncadd (%p1295_p6), %s163_s27, 4294967168  ;;  %s171_s8 = sand.u32 1, %s918_s10   ;;  %p1296_p8 = scmp.ne.s32.totalorder %s1292_s9, 0 }
  0x5b   : > { %s614_s20 = sshll.u32 %s171_s8, 3  ;;  %s172_s28 = scalar_lea.sflag [#allocation10], %s171_s8 }
  0x5c   : > { %s175_s4 = scalar_lea.vmem [#allocation9], %s614_s20 }
  0x5d   : > { %905 = dma.done.wait (%p1296_p8), %s172_s28, 128  }
  0x5e   : > { %907 = vsyncadd (%p1296_p8), %s172_s28, 4294967168  ;;  %p196_p0 = scmp.eq.s32.totalorder %s942_s16, 0  ;;  %p197_p5 = scmp.eq.s32.totalorder %s938_s15, 0 }
  0x60   : > { %p198_p11 = pnand %p197_p5, %p196_p0 }
  0x61   : > { %vm202_vm0 = vcmask (!%p198_p11), 57344   ;;  %vm205_vm1 = vcmask (!%p198_p11), 0   ;;  %v958_v0 = vmov (!%p198_p11), 0.0  }
  0x62   : > { %201 = sbr.rel (%p198_p11) target bundleno = 105 (0x69), region = 40  ;;  %203 = vst.msk [vmem:[#allocation3] sm:$0x1] (!%p198_p11), %vm202_vm0, %v958_v0  ;;  %204 = vst.msk [vmem:[#allocation3 + $0x1] sm:$0x1] (!%p198_p11), %vm202_vm0, %v958_v0 }
  0x63   : > { %206 = vst.msk [vmem:[#allocation4] sm:$0x1] (!%p198_p11), %vm205_vm1, %v958_v0  ;;  %207 = vst.msk [vmem:[#allocation5] sm:$0x1] (!%p198_p11), %vm205_vm1, %v958_v0 }
  0x64   : > { %208 = vst.msk [vmem:[#allocation11] sm:$0x1] (!%p198_p11), %vm205_vm1, %v958_v0 }
  0x69 PF: > { %p615_p10 = scmp.ne.s32.totalorder %s938_s15, 0 }
  0x6a   : > { %vm212_vm2 = vcmask (!%p615_p10), 7168   ;;  %v959_v1 = vmov (!%p615_p10), 0.0  }
  0x6b   : > { %211 = sbr.rel (%p615_p10) target bundleno = 114 (0x72), region = 44  ;;  %213 = vst.msk [vmem:[#allocation2] sm:$0xff] (!%p615_p10), %vm212_vm2, %v959_v1 }
  0x72 PF: > { %v215_v2 = vld [vmem:[%s175_s4] sm:$0xff]  ;;  %vm216_vm3 = vcmask 261120   ;;  %v214_v3 = vld [vmem:[%s166_s29] sm:$0xff]  ;;  %v960_v5 = vmov 0.0   ;;  %vm961_vm4 = vmmov 0   ;;  %v338_v16 = vlaneseq  ;;  %s354_s23 = scalar_lea.vmem [#allocation3], %s938_s15  ;;  %p620_p12 = scmp.ne.s32.totalorder %s942_s16, %s938_s15 }
  0x73   : > { %v299_v4 = vmul.f32 %v215_v2, %v215_v2  ;;  %630 = vmatprep.subr.mxu0 %v960_v5  ;;  %632 = vmatprep.mubr.msk.f32.mxu0 %vm961_vm4, %v960_v5  ;;  %v293_v6 = vmul.f32 %v214_v3, %v214_v3  ;;  %vm347_vm5 = vcmask 64512   ;;  %v962_v28 = vmov 1.0   ;;  %v346_v29 = vld [vmem:[#allocation2] sm:$0xff]  ;;  %v440_v46 = vld [vmem:[#allocation5] sm:$0x1] (!%p620_p12) }
  0x74   : > { %631 = vmatpush3.xpose.msk.msra.mxu0 %vm216_vm3, %v215_v2  ;;  %635 = vmatprep.subr.mxu1 %v960_v5  ;;  %v339_v17 = vshrl.u32 %v338_v16, 7  ;;  %vm352_vm6 = vcmask 7168   ;;  %v355_v32 = vld [vmem:[%s354_s23] sm:$0x1]  ;;  %vm430_vm7 = vcmask 57344   ;;  %v439_v36 = vand.u32 (!%p620_p12), 127, %v338_v16 }
  0x75   : > { %v300_v7 = vsel %vm216_vm3, %v299_v4, 0.0  ;;  %637 = vmatprep.mubr.msk.f32.mxu1 %vm961_vm4, %v960_v5  ;;  %v294_v8 = vsel %vm216_vm3, %v293_v6, 0.0  ;;  %vm455_vm9 = vcmask (!%p620_p12), 0  }
  0x76   : > { %301 = vadd.xlane.f32.xlu0 %v300_v7  ;;  %v340_v19 = vsub.s32 0, %v339_v17  ;;  %vm441_vm8 = vcmp.eq.s32.totalorder (!%p620_p12), %v339_v17, %v439_v36 }
  0x77   : > { %633 = vmatmul.mubr.msk.f32.vlgmr.msra.gmra.mrb[0].mxu0 %vm216_vm3, %v214_v3 }
  0x7a   : > { %295 = vadd.xlane.f32.xlu0 %v294_v8 }
 0x103   : > { %v302_v9 = vpop.xlane.xlu0 %301 }
 0x104   : > { %v303_v10 = vmax.f32 %v302_v9, 1e-16 }
 0x106   : > { %758 = vrsqrt.f32 %v303_v10 }
 0x107   : > { %v296_v14 = vpop.xlane.xlu0 %295 }
 0x108   : > { %v297_v15 = vmax.f32 %v296_v14, 1e-16 }
 0x10a   : > { %760 = vrsqrt.f32 %v297_v15 }
 0x110   : > { %v759_v11 = vpop.eup %758 }
 0x111   : > { %306 = vxpose.xlu1.b32.start.end [1/1] (short) (narrow) %v759_v11, 8 }
 0x114   : > { %v761_v18 = vpop.eup %760 }
 0x14a   : > { %v289_v12 = vpop.f32.mrb[0].mxu0 }
 0x14b   : > { %v634_v13 = vpop.f32.mrb[1].mxu0  ;;  %v305_v20 = vmul.f32 %v761_v18, %v289_v12 }
 0x191   : > { %v322_v21 = vpop.trf.xlu1 }
 0x192   : > { %v341_v22 = vrot.slane %v322_v21, %v340_v19 }
 0x194   : > { %v342_v23 = vmul.f32 %v341_v22, %v305_v20 }
 0x196   : > { %v618_v24 = vadd.f32 -1.0, %v342_v23 }
 0x198   : > { %v344_v25 = vmul.f32 1.442695, %v618_v24  ;;  %v442_v37 = vsel (!%p620_p12), %vm441_vm8, %v618_v24, 0.0 }
 0x199   : > { %v443_v38 = vsel (!%p620_p12), %vm347_vm5, %v442_v37, 0.0 }
 0x19a   : > { %762 = vpow2.f32 %v344_v25  ;;  %444 = vadd.xlane.f32.xlu0 (!%p620_p12), %v443_v38 }
 0x1a4   : > { %v763_v26 = vpop.eup %762 }
 0x1a5   : > { %636 = vmatpush3.msra.mxu1 %v763_v26  ;;  %v348_v27 = vsel %vm347_vm5, %v763_v26, 0.0 }
 0x1a6   : > { %638 = vmatmul.mubr.msk.f32.vlgmr.msra.gmra.mrb[0].mxu1 %vm347_vm5, %v962_v28  ;;  %349 = vadd.xlane.f32.xlu1 %v348_v27 }
 0x227   : > { %v445_v39 = vpop.xlane.xlu0 (!%p620_p12), %444 }
 0x228   : > { %v446_v40 = vrot.slane (!%p620_p12), %v445_v39, 4 }
 0x22a   : > { %v447_v41 = vadd.f32 (!%p620_p12), %v446_v40, %v445_v39 }
 0x22c   : > { %v448_v42 = vrot.slane (!%p620_p12), %v447_v41, 2 }
 0x22e   : > { %v449_v43 = vadd.f32 (!%p620_p12), %v448_v42, %v447_v41 }
 0x230   : > { %v450_v44 = vrot.slane (!%p620_p12), %v449_v43, 1 }
 0x232   : > { %v451_v45 = vadd.f32 (!%p620_p12), %v450_v44, %v449_v43 }
 0x233   : > { %v350_v30 = vpop.xlane.xlu1 %349 }
 0x234   : > { %v351_v31 = vadd.f32 %v350_v30, %v346_v29  ;;  %640 = vpush (!%p620_p12), %v451_v45 }
 0x236   : > { %353 = vst.msk [vmem:[#allocation2] sm:$0xff] %vm352_vm6, %v351_v31 }
 0x265   : > { %s641_s9 = spop (!%p620_p12), %640 }
 0x266   : > { %v453_v47 = vstv (!%p620_p12), %s641_s9 }
 0x267   : > { %v454_v48 = vadd.f32 (!%p620_p12), %v453_v47, %v440_v46 }
 0x269   : > { %456 = vst.msk [vmem:[#allocation5] sm:$0x1] (!%p620_p12), %vm455_vm9, %v454_v48 }
 0x276   : > { %435 = sbr.rel (%p620_p12) target bundleno = 637 (0x27d), region = 48 }
 0x279   : > { %v425_v33 = vpop.f32.mrb[0].mxu1 }
 0x27a   : > { %v429_v34 = vadd.f32 %v425_v33, %v355_v32  ;;  %v639_v35 = vpop.f32.mrb[1].mxu1 }
 0x27c   : > { %431 = vst.msk [vmem:[%s354_s23] sm:$0x1] %vm430_vm7, %v429_v34 }
 0x27d PF: > { %p457_p2 = scmp.eq.s32.totalorder %s938_s15, 1  ;;  %p621_p3 = scmp.ne.s32.totalorder %s938_s15, 1 }
 0x27e   : > { %v462_v49 = vld [vmem:[#allocation2] sm:$0xff] (!%p621_p3)  ;;  %v461_v60 = vld [vmem:[#allocation4] sm:$0x1] (!%p621_p3)  ;;  %vm477_vm10 = vcmask (!%p621_p3), 0  }
 0x27f   : > { %460 = sbr.rel (%p621_p3) target bundleno = 861 (0x35d), region = 52  ;;  %764 = vlog2.f32 (!%p621_p3), %v462_v49 }
 0x289   : > { %v765_v50 = vpop.eup %764 }
 0x28a   : > { %v464_v51 = vmul.f32 0.6931472, %v765_v50 }
 0x28c   : > { %v465_v52 = vsel %vm352_vm6, %v464_v51, 0.0 }
 0x28d   : > { %466 = vadd.xlane.f32.xlu0 %v465_v52 }
 0x31a   : > { %v467_v53 = vpop.xlane.xlu0 %466 }
 0x31b   : > { %v468_v54 = vrot.slane %v467_v53, 4 }
 0x31d   : > { %v469_v55 = vadd.f32 %v468_v54, %v467_v53 }
 0x31f   : > { %v470_v56 = vrot.slane %v469_v55, 2 }
 0x321   : > { %v471_v57 = vadd.f32 %v470_v56, %v469_v55 }
 0x323   : > { %v472_v58 = vrot.slane %v471_v57, 1 }
 0x325   : > { %v473_v59 = vadd.f32 %v472_v58, %v471_v57 }
 0x327   : > { %642 = vpush %v473_v59 }
 0x358   : > { %s643_s6 = spop %642 }
 0x359   : > { %v475_v61 = vstv %s643_s6 }
 0x35a   : > { %v476_v62 = vadd.f32 %v475_v61, %v461_v60 }
 0x35c   : > { %478 = vst.msk [vmem:[#allocation4] sm:$0x1] %vm477_vm10, %v476_v62 }
 0x35d PF: > { %p479_p1 = scmp.eq.s32.totalorder %s942_s16, 1 }
 0x35f   : > { %p480_p9 = pnand %p479_p1, %p457_p2 }
 0x360   : > { %v484_v63 = vld [vmem:[#allocation3] sm:$0x1] (!%p480_p9)  ;;  %v485_v0 = vld [vmem:[#allocation3 + $0x1] sm:$0x1] (!%p480_p9)  ;;  %v507_v18 = vld [vmem:[#allocation5] sm:$0x1] (!%p480_p9) }
 0x361   : > { %483 = sbr.rel (%p480_p9) target bundleno = 1096 (0x448), region = 56  ;;  %766 = vlog2.f32 (!%p480_p9), %v484_v63  ;;  %vm510_vm11 = vcmask (!%p480_p9), 0  }
 0x362   : > { %768 = vlog2.f32 (!%p480_p9), %v485_v0 }
 0x363   : > { %v502_v15 = vld [vmem:[#allocation4] sm:$0x1] (!%p480_p9) }
 0x364   : > { %v503_v16 = vmul.f32 (!%p480_p9), 0.99, %v502_v15 }
 0x36b   : > { %v767_v1 = vpop.eup %766 }
 0x36c   : > { %v769_v2 = vpop.eup %768  ;;  %v487_v3 = vmul.f32 0.6931472, %v767_v1 }
 0x36d   : > { %v489_v4 = vmul.f32 0.6931472, %v769_v2 }
 0x36e   : > { %v490_v5 = vsel %vm430_vm7, %v487_v3, 0.0 }
 0x36f   : > { %v491_v6 = vsel %vm430_vm7, %v489_v4, 0.0 }
 0x370   : > { %v492_v7 = vadd.f32 %v491_v6, %v490_v5 }
 0x372   : > { %493 = vadd.xlane.f32.xlu0 %v492_v7 }
 0x3ff   : > { %v494_v8 = vpop.xlane.xlu0 %493 }
 0x400   : > { %v495_v9 = vrot.slane %v494_v8, 4 }
 0x402   : > { %v496_v10 = vadd.f32 %v495_v9, %v494_v8 }
 0x404   : > { %v497_v11 = vrot.slane %v496_v10, 2 }
 0x406   : > { %v498_v12 = vadd.f32 %v497_v11, %v496_v10 }
 0x408   : > { %v499_v13 = vrot.slane %v498_v12, 1 }
 0x40a   : > { %v500_v14 = vadd.f32 %v499_v13, %v498_v12 }
 0x40c   : > { %644 = vpush %v500_v14 }
 0x43d   : > { %s645_s15 = spop %644 }
 0x43e   : > { %s504_s16 = smul.f32 0.01, %s645_s15 }
 0x440   : > { %v505_v17 = vstv %s504_s16 }
 0x441   : > { %v506_v19 = vadd.f32 %v505_v17, %v503_v16 }
 0x443   : > { %v508_v20 = vsub.f32 %v506_v19, %v507_v18 }
 0x445   : > { %v509_v21 = vmul.f32 0.0625, %v508_v20 }
 0x447   : > { %511 = vst.msk [vmem:[#allocation11] sm:$0x1] %vm510_vm11, %v509_v21 }
 0x448 PF: > { %s1297_s3 = sadd.s32 4294967295, %s954_s19   ;;  %s963_s26 = smov [#allocation11]  }
 0x449   : > { %p1217_p13 = scmp.eq.s32.totalorder %s1297_s3, 3  ;;  %s519_s24 = sshll.u32 %s963_s26, 4  ;;  %s520_s24 = int_to_ptr.vmem [resolvable:$true] %s519_s24 }
 0x44a   : > { %s830_s25 = scalar_lea.vmem %s520_s24, 16  ;;  %s836_s5 = scalar_lea.vmem %s520_s24, 32 }
 0x44b   : > { %p831_p7 = scmp.ne.s32.totalorder %s520_s24, %s830_s25  ;;  %p837_p8 = scmp.lt.s32.totalorder %s520_s24, %s520_s24 }
 0x44c   : > { %p838_p0 = scmp.lt.s32.totalorder %s836_s5, %s830_s25 }
 0x44d   : > { %p832_p4 = pnand %p831_p7, %p1217_p13 }
 0x44e   : > { %p839_p5 = por %p838_p0, %p837_p8 }
 0x44f   : > { %p833_p6 = pneg %p832_p4 }
 0x451   : > { %p840_p11 = pnand %p839_p5, %p833_p6 }
 0x453   : > { %843 = shalt.err (!%p840_p11)
}
 0x454   : > { %s844_s8 = scalar_lea.hbm %s1278_s2, 16 }
 0x455   : > { %p845_p10 = scmp.ne.s32.totalorder %s1278_s2, %s844_s8  ;;  %p850_p3 = scmp.lt.u32.totalorder %s844_s8, %s1278_s2 }
 0x457   : > { %p846_p12 = pnand %p845_p10, %p1217_p13 }
 0x459   : > { %p847_p2 = pneg %p846_p12 }
 0x45b   : > { %p852_p1 = pnand %p850_p3, %p847_p2 }
 0x45d   : > { %855 = shalt.err (!%p852_p1)
}
 0x45e   : > { %651 = dma.vmem_to_hbm [thread:$0]  (%p1217_p13), %s520_s24, 16, %s1278_s2, [#allocation8]  }
 0x45f   : > { %909 = dma.done.wait (%p1217_p13), [#allocation8], 16  }
 0x460   : > { %911 = vsyncadd (%p1217_p13), [#allocation8], 4294967280 }
 0x461 PF: > { %s19_s19 = sadd.s32 1, %s954_s19   ;;  %s1299_s9 = smov %s918_s10 }
 0x462   : > { %p16_p9 = scmp.ge.s32.totalorder %s19_s19, 6   ;;  %s1300_s10 = smov %s922_s11 }
 0x463   : > { %s1301_s11 = smov %s1133_s12  ;;  %s1302_s12 = smov %s930_s13 }
 0x464   : > { %s1303_s13 = smov %s934_s14  ;;  %s1304_s14 = smov %s1139_s30 }
 0x465   : > { %s1305_s15 = smov %s946_s17  ;;  %s1306_s16 = smov %s950_s18 }
 0x466   : > { %s1307_s17 = smov %s1310_s7  ;;  %s1308_s18 = smov %s1314_s21 }
 0x467   :  { %18 = sbr.rel (!%p16_p9) target bundleno = 10 (0xa), region = 99 }
 0x46e   :  { %532 = vsyncpa [#allocation7], 1 }
 0x46f   :  { %534 = vsyncpa [#allocation7 + $0x1], 1 }
 0x470   :  { %535 = vsyncpa [#allocation10], 1 }
 0x471   :  { %537 = vsyncpa [#allocation10 + $0x1], 1 }
 0x472   :  { %538 = vsyncpa [#allocation8], 1 }
 0x473   :  { %540 = vsyncpa [#allocation8 + $0x1], 1 }

</bundles_post_ra>
